<compile_context>
chip_gen: v7x
topology: tpu7x:2x2x1
jax: 0.10.0
libtpu: 0.0.40
codegen_flags: <defaults>
</compile_context>

<pallas_src>
import functools

import jax
import jax.numpy as jnp
from jax import lax
from jax.experimental import pallas as pl
from jax.experimental.pallas import tpu as pltpu

IN_FEATURES = 84
OUT_FEATURES = 10


def _default_pack_groups():
    """Pack 3 batch rows per MXU row only where the MXU is 256 wide (v6e/v7x)."""
    try:
        kind = jax.devices()[0].device_kind.lower()
    except Exception:
        return 1
    return 3 if ("v6" in kind or "v7" in kind) else 1


_PACK_G = _default_pack_groups()


def _log_softmax_lastdim(logits):
    m = jnp.max(logits, axis=-1, keepdims=True)
    shifted = logits - m
    lse = jnp.log(jnp.sum(jnp.exp(shifted), axis=-1, keepdims=True))
    return shifted - lse


def f5_kernel(x_ref, w_ref, b_ref, o_ref):
    """Unpacked: x (TB, F_in), w (F_out, F_in), b (1, F_out), o (TB, F_out)."""
    logits = lax.dot_general(
        x_ref[...], w_ref[...],
        dimension_numbers=(((1,), (1,)), ((), ())),   # contract shared F_in axis
        preferred_element_type=jnp.float32,
    ) + b_ref[...].astype(jnp.float32)
    o_ref[...] = _log_softmax_lastdim(logits).astype(o_ref.dtype)


def f5_packed_kernel(x_ref, w_ref, b_ref, o_ref, *, groups, f_out):
    """Packed: x (TB, G*F_in), w (G*F_in, G*F_out) block-diagonal, b (1, G*F_out).

    Each output row holds G independent 10-wide logit groups; log-softmax is
    applied segment-wise over each group with masked max/sum reductions.
    """
    logits = jnp.dot(
        x_ref[...], w_ref[...], preferred_element_type=jnp.float32
    ) + b_ref[...].astype(jnp.float32)

    if groups == 1:
        o_ref[...] = _log_softmax_lastdim(logits).astype(o_ref.dtype)
        return

    gid = lax.broadcasted_iota(jnp.int32, logits.shape, 1) // f_out
    neg_inf = jnp.float32(-jnp.inf)

    m = jnp.full_like(logits, neg_inf)
    for g in range(groups):
        sel = gid == g
        mg = jnp.max(jnp.where(sel, logits, neg_inf), axis=-1, keepdims=True)
        m = jnp.where(sel, mg, m)

    shifted = logits - m
    e = jnp.exp(shifted)

    s = jnp.zeros_like(logits)
    for g in range(groups):
        sel = gid == g
        sg = jnp.sum(jnp.where(sel, e, 0.0), axis=-1, keepdims=True)
        s = jnp.where(sel, sg, s)

    o_ref[...] = (shifted - jnp.log(s)).astype(o_ref.dtype)


def _choose_tile_rows(total_rows, max_tile_rows):
    """Pick a sublane-aligned tile so the grid has >=2 roughly equal tiles
    (even count preferred -> both v7x TensorCores stay busy)."""
    max_tile_rows = max(8, (max_tile_rows // 8) * 8)
    num_tiles = pl.cdiv(total_rows, max_tile_rows)
    if num_tiles > 1 and num_tiles % 2 == 1:
        num_tiles += 1
    tile_rows = ((pl.cdiv(total_rows, num_tiles) + 7) // 8) * 8
    return min(tile_rows, max_tile_rows)


@functools.partial(jax.jit, static_argnames=("tile_b", "pack_groups"))
def f5_forward(x, weight, bias, *, tile_b=4096, pack_groups=_PACK_G):
    """x: (B, in_features); weight: (out_features, in_features); bias: (out_features,)"""
    B, f_in = x.shape
    f_out = weight.shape[0]
    b2 = bias.reshape(1, f_out)

    if B <= tile_b:
        # Single ungridded call: whole problem fits comfortably in VMEM; one
        # DMA in/out beats any pipelined grid at this size.
        return pl.pallas_call(
            f5_kernel,
            out_shape=jax.ShapeDtypeStruct((B, f_out), x.dtype),
            in_specs=[
                pl.BlockSpec(memory_space=pltpu.MemorySpace.VMEM),
                pl.BlockSpec(memory_space=pltpu.MemorySpace.VMEM),
                pl.BlockSpec(memory_space=pltpu.MemorySpace.VMEM),
            ],
            out_specs=pl.BlockSpec(memory_space=pltpu.MemorySpace.VMEM),
        )(x, weight, b2)

    # ---------------- Gridded, row-packed large-batch path ----------------
    g = max(1, int(pack_groups))
    b_pad = pl.cdiv(B, g) * g
    x_p = jnp.pad(x, ((0, b_pad - B), (0, 0))) if b_pad != B else x
    # (B, F_in) -> (B/g, g*F_in): g consecutive batch rows share one MXU row.
    x_packed = x_p.reshape(b_pad // g, g * f_in)
    # Block-diagonal weight (g*F_in, g*F_out) and tiled bias, built once, so
    # x_packed @ w_packed yields the g per-row logit groups side by side.
    w_packed = jnp.kron(jnp.eye(g, dtype=weight.dtype), weight.T)
    b_packed = jnp.tile(b2, (1, g))

    total_rows = b_pad // g
    tile_rows = _choose_tile_rows(total_rows, tile_b // g)
    grid = (pl.cdiv(total_rows, tile_rows),)

    kern = functools.partial(f5_packed_kernel, groups=g, f_out=f_out)
    out_packed = pl.pallas_call(
        kern,
        out_shape=jax.ShapeDtypeStruct((total_rows, g * f_out), x.dtype),
        grid_spec=pl.GridSpec(
            grid=grid,
            in_specs=[
                pl.BlockSpec((tile_rows, g * f_in), lambda i: (i, 0)),
                pl.BlockSpec((g * f_in, g * f_out), lambda i: (0, 0)),  # resident
                pl.BlockSpec((1, g * f_out), lambda i: (0, 0)),          # resident
            ],
            out_specs=pl.BlockSpec((tile_rows, g * f_out), lambda i: (i, 0)),
        ),
        compiler_params=pltpu.CompilerParams(
            dimension_semantics=("parallel",),
            # Headroom above v5e's 16 MiB scoped default; well under the
            # 64 MiB physical per-TC VMEM of v7x.
            vmem_limit_bytes=32 * 1024 * 1024,
        ),
    )(x_packed, w_packed, b_packed)

    # (B/g, g*F_out) -> (B, F_out): pure metadata reshape + slice of padding.
    return out_packed.reshape(b_pad, f_out)[:B]


def reference_forward(x, weight, bias):
    logits = x @ weight.T + bias
    return jax.nn.log_softmax(logits, axis=-1)


if __name__ == "__main__":
    key = jax.random.PRNGKey(0)
    k_x, k_w, k_b, k_x2 = jax.random.split(key, 4)

    # Deterministic parameter init (PyTorch Linear-style uniform bound).
    bound = 1.0 / jnp.sqrt(jnp.float32(IN_FEATURES))
    weight = jax.random.uniform(k_w, (OUT_FEATURES, IN_FEATURES),
                                dtype=jnp.float32, minval=-bound, maxval=bound)
    bias = jax.random.uniform(k_b, (OUT_FEATURES,),
                              dtype=jnp.float32, minval=-bound, maxval=bound)

    # Small batch -> ungridded single-block path.
    x = jax.random.normal(k_x, (2, IN_FEATURES), dtype=jnp.float32)
    out = jax.block_until_ready(f5_forward(x, weight, bias))
    ref = reference_forward(x, weight, bias)
    assert out.shape == (2, OUT_FEATURES)
    assert jnp.allclose(out, ref, atol=1e-5, rtol=1e-5)

    # Larger batch -> gridded, row-packed path (B % G != 0, partial last tile).
    B2 = 5000
    x2 = jax.random.normal(k_x2, (B2, IN_FEATURES), dtype=jnp.float32)
    out2 = jax.block_until_ready(f5_forward(x2, weight, bias, tile_b=2048))
    ref2 = reference_forward(x2, weight, bias)
    assert out2.shape == (B2, OUT_FEATURES)
    assert jnp.allclose(out2, ref2, atol=1e-5, rtol=1e-5)

    print("KERNEL_OK")
</pallas_src>

<mosaic_0001>
module attributes {stable_mosaic.version = 11 : i64} {
  func.func @f5_kernel(%arg0: memref<2x84xf32, #tpu.memory_space<vmem>>, %arg1: memref<10x84xf32, #tpu.memory_space<vmem>>, %arg2: memref<1x10xf32, #tpu.memory_space<vmem>>, %arg3: memref<2x10xf32, #tpu.memory_space<vmem>>) attributes {dimension_semantics = [], scalar_prefetch = 0 : i64, scratch_operands = 0 : i64, tpu.core_type = #tpu.core_type<tc>} {
    %c0 = arith.constant 0 : index
    %c0_0 = arith.constant 0 : index
    %0 = vector.load %arg0[%c0, %c0_0] : memref<2x84xf32, #tpu.memory_space<vmem>>, vector<2x84xf32>
    %c0_1 = arith.constant 0 : index
    %c0_2 = arith.constant 0 : index
    %1 = vector.load %arg1[%c0_1, %c0_2] : memref<10x84xf32, #tpu.memory_space<vmem>>, vector<10x84xf32>
    %cst = arith.constant dense<0.000000e+00> : vector<2x10xf32>
    %2 = tpu.matmul %0, %1, %cst {dimension_numbers = #tpu.dot_dimension_numbers<[1], [1], [0], [0], [0, 0, 1, 0], [], []>} : vector<2x84xf32>, vector<10x84xf32>, vector<2x10xf32> -> vector<2x10xf32>
    %c0_3 = arith.constant 0 : index
    %c0_4 = arith.constant 0 : index
    %3 = vector.load %arg2[%c0_3, %c0_4] : memref<1x10xf32, #tpu.memory_space<vmem>>, vector<1x10xf32>
    %4 = vector.broadcast %3 : vector<1x10xf32> to vector<2x10xf32>
    %5 = arith.addf %2, %4 : vector<2x10xf32>
    %cst_5 = arith.constant dense<0xFF800000> : vector<2xf32>
    %6 = vector.multi_reduction <maximumf>, %5, %cst_5 [1] : vector<2x10xf32> to vector<2xf32>
    %7 = vector.shape_cast %6 : vector<2xf32> to vector<2x1xf32>
    %8 = vector.broadcast %7 : vector<2x1xf32> to vector<2x10xf32>
    %9 = arith.subf %5, %8 : vector<2x10xf32>
    %10 = math.exp %9 : vector<2x10xf32>
    %cst_6 = arith.constant dense<0.000000e+00> : vector<2xf32>
    %11 = vector.multi_reduction <add>, %10, %cst_6 [1] : vector<2x10xf32> to vector<2xf32>
    %12 = vector.shape_cast %11 : vector<2xf32> to vector<2x1xf32>
    %13 = math.log %12 : vector<2x1xf32>
    %14 = vector.broadcast %13 : vector<2x1xf32> to vector<2x10xf32>
    %15 = arith.subf %9, %14 : vector<2x10xf32>
    %c0_7 = arith.constant 0 : index
    %c0_8 = arith.constant 0 : index
    %16 = vector.load %arg3[%c0_7, %c0_8] : memref<2x10xf32, #tpu.memory_space<vmem>>, vector<2x10xf32>
    tpu.vector_store %arg3[%c0_7, %c0_8], %15 {strides = array<i32>} : memref<2x10xf32, #tpu.memory_space<vmem>>, vector<2x10xf32>,
    return
  }
}

</mosaic_0001>

<bundles_post_ra>
// kernel: f5_forward.1
= control target key start
LH: loop header
LB: loop body
LE: loop exit
PB: predicated region body
PF: predicated region fallthrough
CT: control target
= control target key end

     0   :  { %8 = vsyncpa [#allocation3], 0  ;;  %s285_s0 = inlined_call_operand.vmem [shape: f32[2,84], index: 0, kind: input, shape index: {}]   ;;  %s286_s1 = inlined_call_operand.hbm [shape: f32[10,84], index: 1, kind: input, shape index: {}]   ;;  %s287_s2 = inlined_call_operand.vmem [shape: f32[1,10], index: 2, kind: input, shape index: {}]   ;;  %s288_s3 = inlined_call_operand.hbm [shape: f32[2,10], index: 3, kind: output, shape index: {}]  }
   0x1   :  { %9 = vsyncpa [#allocation4], 0  ;;  %s225_s12 = smov [#allocation2]   ;;  %s177_s16 = scalar_lea.hbm %s286_s1, 256 }
   0x2   :  { %s17_s13 = sshll.u32 %s225_s12, 4  ;;  %p178_p0 = scmp.ne.s32.totalorder %s286_s1, %s177_s16  ;;  %s18_s13 = int_to_ptr.vmem [resolvable:$true] %s17_s13 }
   0x3   :  { %p181_p1 = scmp.lt.u32.totalorder %s177_s16, %s286_s1 }
   0x5   :  { %p183_p2 = pnand %p181_p1, %p178_p0 }
   0x7   :  { %186 = shalt.err (!%p183_p2)
}
   0x8   :  { %s187_s21 = scalar_lea.vmem %s18_s13, 256  ;;  %p192_p4 = scmp.lt.s32.totalorder %s18_s13, %s18_s13 }
   0x9   :  { %p188_p3 = scmp.ne.s32.totalorder %s18_s13, %s187_s21  ;;  %p193_p5 = scmp.lt.s32.totalorder %s187_s21, %s187_s21 }
   0xb   :  { %p194_p6 = por %p193_p5, %p192_p4 }
   0xd   :  { %p195_p7 = pnand %p194_p6, %p188_p3 }
   0xf   :  { %198 = shalt.err (!%p195_p7)
}
  0x10   :  { %s226_s22 = smov 128   ;;  %s227_s23 = smov 8  }
  0x11   :  { %23 = dma.hbm_to_vmem [thread:$0]  %s286_s1, 256, %s18_s13, [#allocation3], %s226_s22, %s226_s22, %s227_s23  }
  0x12   :  { %221 = dma.done.wait [#allocation3], 256  }
  0x13   :  { %222 = vsyncadd [#allocation3], 4294967040  ;;  %v228_v0 = vmov 0.0|0.0   ;;  %vm229_vm0 = vmmov 0   ;;  %v230_v1 = vmov 0.0   ;;  %vm39_vm1 = vcmask 687104  }
  0x14   :  { %162 = vmatprep.subr.bf16.mxu0 %v228_v0  ;;  %159 = vmatprep.mubr.msk.f32.mxu0 %vm229_vm0, %v230_v1  ;;  %v30_v2 = vld [vmem:[#allocation2] sm:$0xff]  ;;  %v31_v3 = vld [vmem:[#allocation2 + $0x8] sm:$0x3]  ;;  %vm164_vm2 = vmpackc.low %vm39_vm1, %vm39_vm1  ;;  %vm119_vm3 = vcmask 74752  }
  0x15   :  { %v163_v4 = vpack.c.bf16 %v31_v3, %v30_v2  ;;  %v29_v5 = vld [vmem:[%s285_s0] sm:$0x3]  ;;  %s231_s0 = smov [#allocation5]  }
  0x16   :  { %v148_v6 = vld [vmem:[%s287_s2] ss:$0 sm:$0xff]  ;;  %s139_s2 = sshll.u32 %s231_s0, 4  ;;  %s140_s2 = int_to_ptr.vmem [resolvable:$true] %s139_s2 }
  0x17   :  { %165 = vmatpush3.bf16.xpose.msk.msra.mxu0 %vm164_vm2, %v163_v4  ;;  %s199_s29 = scalar_lea.vmem %s140_s2, 32  ;;  %p204_p9 = scmp.lt.s32.totalorder %s140_s2, %s140_s2 }
  0x18   :  { %p200_p8 = scmp.ne.s32.totalorder %s140_s2, %s199_s29  ;;  %p205_p10 = scmp.lt.s32.totalorder %s199_s29, %s199_s29 }
  0x1a   :  { %p206_p11 = por %p205_p10, %p204_p9 }
  0x1c   :  { %p207_p12 = pnand %p206_p11, %p200_p8 }
  0x1e   :  { %160 = vmatmul.mubr.msk.f32.vlgmr.msra.gmra.mrb[0].mxu0 %vm39_vm1, %v29_v5 }
  0xf1   :  { %v115_v7 = vpop.f32.mrb[0].mxu0 }
  0xf2   :  { %v116_v8 = vadd.f32 %v148_v6, %v115_v7  ;;  %v161_v9 = vpop.f32.mrb[1].mxu0 }
  0xf4   :  { %v120_v10 = vsel %vm119_vm3, %v116_v8, -inf }
  0xf5   :  { %121 = vmax.xlane.f32.xlu0 %v120_v10 }
 0x182   :  { %v122_v11 = vpop.xlane.xlu0 %121 }
 0x183   :  { %v123_v12 = vsub.f32 %v116_v8, %v122_v11 }
 0x185   :  { %v124_v13 = vmul.f32 1.442695, %v123_v12 }
 0x187   :  { %173 = vpow2.f32 %v124_v13 }
 0x191   :  { %v174_v14 = vpop.eup %173 }
 0x192   :  { %v126_v15 = vsel %vm119_vm3, %v174_v14, 0.0 }
 0x193   :  { %127 = vadd.xlane.f32.xlu0 %v126_v15 }
 0x220   :  { %v128_v16 = vpop.xlane.xlu0 %127 }
 0x221   :  { %175 = vlog2.f32 %v128_v16 }
 0x22b   :  { %v176_v17 = vpop.eup %175 }
 0x22c   :  { %v130_v18 = vmul.f32 0.6931472, %v176_v17 }
 0x22e   :  { %v131_v19 = vsub.f32 %v123_v12, %v130_v18 }
 0x230   :  { %132 = vst.msk [vmem:[#allocation5] sm:$0x3] %vm119_vm3, %v131_v19 }
 0x231   :  { %210 = shalt.err (!%p207_p12)
}
 0x232   :  { %s211_s5 = scalar_lea.hbm %s288_s3, 32 }
 0x233   :  { %p212_p13 = scmp.ne.s32.totalorder %s288_s3, %s211_s5  ;;  %p215_p0 = scmp.lt.u32.totalorder %s211_s5, %s288_s3 }
 0x235   :  { %p217_p1 = pnand %p215_p0, %p212_p13 }
 0x237   :  { %220 = shalt.err (!%p217_p1)
}
 0x238   :  { %142 = dma.vmem_to_hbm [thread:$0]  %s140_s2, 32, %s288_s3, [#allocation4]  }
 0x239   :  { %223 = dma.done.wait [#allocation4], 32  }
 0x23a   :  { %224 = vsyncadd [#allocation4], 4294967264 }
 0x23b   :  { %146 = vsyncpa [#allocation3], 1 }
 0x23c   :  { %147 = vsyncpa [#allocation4], 1 }

</bundles_post_ra>
